<compile_context>
chip_gen: v6e
topology: v6e:2x2x1
jax: 0.10.0
libtpu: 0.0.40
codegen_flags: <defaults>
</compile_context>

<pallas_src>
import jax
import jax.numpy as jnp
from jax.experimental import pallas as pl
from jax.experimental.pallas import tpu as pltpu

_LANES = 128
_MAX_BLOCK_SUBLANES = 512     # 512 x 128 = 64K batch elems/step; blocks stay ~1.5 MiB
_TARGET_GRID_STEPS = 4        # >= 2 steps per TensorCore on v7x, keeps the pipeline busy
_PALLAS_MIN_BATCH = 16384     # below this a single fused XLA pass wins on fixed overhead


def _round_up(x, m):
    return ((x + m - 1) // m) * m


def _customers_kernel(wa_ref, wb_ref, bias_ref, cs_ref, ag_ref, o_ref):
    """One batch tile.

    wa_ref, wb_ref : VMEM [128, 128*F] interleaving matrices; constant index_map
                     -> fetched once, reused across all grid steps.
                     wa[l, F*l + j] = W[0, j], wb[l, F*l + j] = W[1, j], 0 elsewhere.
    bias_ref       : VMEM [1, 128*F]   bias tiled along lanes (bias[c % F]).
    cs_ref, ag_ref : VMEM [block_sub, 128]  batch packed (sublane, lane)-dense.
    o_ref          : VMEM [block_sub, 128*F] lane-dense, already interleaved:
                     o[r, F*l + j] = feature j of batch element (row*128 + l).
    """
    acc = jnp.dot(cs_ref[...], wa_ref[...], preferred_element_type=jnp.float32)
    acc = acc + jnp.dot(ag_ref[...], wb_ref[...], preferred_element_type=jnp.float32)
    o_ref[...] = (acc + bias_ref[...]).astype(o_ref.dtype)


def customers_nn_forward(club_status, age_groups, weight, bias, *,
                         min_pallas_batch=_PALLAS_MIN_BATCH,
                         out_dtype=jnp.float32):
    """Pallas implementation of CustomersNN.forward.

    club_status: [B, 1] float32
    age_groups : [B, 1] float32
    weight     : [in_features=2, out_features=F] float32 (x @ W layout)
    bias       : [F] float32
    returns    : squeeze([B, F])   (matches torch .squeeze(): drops size-1 dims,
                                    e.g. B == 1 returns shape [F])
    """
    assert weight.shape[0] == 2, "CustomersNN concatenates exactly two scalar features"
    assert bias.shape[0] == weight.shape[1], "bias must match out_features"
    out_f = weight.shape[1]

    cs = club_status.reshape(-1).astype(jnp.float32)
    ag = age_groups.reshape(-1).astype(jnp.float32)
    B = cs.shape[0]
    rows = pl.cdiv(B, _LANES)

    if B < min_pallas_batch or rows < 8:
        # Small batch: a single fused XLA pass (no pad, no layout games) is optimal.
        out = (cs[:, None] * weight[0] + ag[:, None] * weight[1] + bias).astype(out_dtype)
        return jnp.squeeze(out)

    # ---- lane-dense packing: batch b -> (row, lane) = (b // 128, b % 128).
    # Pad only to the next 128 multiple, and only when actually ragged.
    b_pad = rows * _LANES
    if b_pad != B:
        cs = jnp.pad(cs, (0, b_pad - B))
        ag = jnp.pad(ag, (0, b_pad - B))
    cs2d = cs.reshape(rows, _LANES)   # contiguous -> free reshape
    ag2d = ag.reshape(rows, _LANES)

    # ---- block size: as big as useful, but keep >= _TARGET_GRID_STEPS grid steps.
    block_sub = min(_MAX_BLOCK_SUBLANES,
                    _round_up(pl.cdiv(rows, _TARGET_GRID_STEPS), 8),
                    _round_up(rows, 8))
    grid = (pl.cdiv(rows, block_sub),)   # last block may be partial: Pallas clips it

    # ---- fold the 2->F linear AND the feature interleave into two sparse matrices.
    out_w = out_f * _LANES
    eye = jnp.eye(_LANES, dtype=jnp.float32)
    wa = jnp.kron(eye, weight[0:1].astype(jnp.float32))        # [128, 128*F]
    wb = jnp.kron(eye, weight[1:2].astype(jnp.float32))        # [128, 128*F]
    bias_row = jnp.tile(bias.astype(jnp.float32), _LANES)[None, :]   # [1, 128*F]

    out2d = pl.pallas_call(
        _customers_kernel,
        out_shape=jax.ShapeDtypeStruct((rows, out_w), out_dtype),
        grid=grid,
        in_specs=[
            pl.BlockSpec((_LANES, out_w), lambda i: (0, 0)),       # wa (constant block)
            pl.BlockSpec((_LANES, out_w), lambda i: (0, 0)),       # wb (constant block)
            pl.BlockSpec((1, out_w), lambda i: (0, 0)),            # bias row
            pl.BlockSpec((block_sub, _LANES), lambda i: (i, 0)),   # club_status tiles
            pl.BlockSpec((block_sub, _LANES), lambda i: (i, 0)),   # age_groups tiles
            # If DMA is still exposed in a trace, pipeline_mode=pl.Buffered(3) on the
            # two input specs / the output spec is a cheap knob to try.
        ],
        out_specs=pl.BlockSpec((block_sub, out_w), lambda i: (i, 0)),
        compiler_params=pltpu.CompilerParams(
            dimension_semantics=("parallel",),     # shard batch blocks across TCs (v7x)
            vmem_limit_bytes=32 * 1024 * 1024,     # blocks total ~4 MiB; safe on v5e-v7x
        ),
    )(wa, wb, bias_row, cs2d, ag2d)

    # Element (r, F*l + j) is batch r*128 + l, feature j -> row-major [B, F] for free.
    out = out2d.reshape(b_pad, out_f)
    if b_pad != B:
        out = out[:B]          # only pays a slice when B is not a 128 multiple
    return jnp.squeeze(out)


def init_params(key, input_size=2, output_size=4):
    """Deterministic init matching nn.Linear's shapes (uniform +/- 1/sqrt(in))."""
    kw, kb = jax.random.split(key)
    bound = 1.0 / jnp.sqrt(input_size)
    # Stored as [in, out] (transpose of torch's [out, in]) for x @ W semantics.
    weight = jax.random.uniform(kw, (input_size, output_size), jnp.float32, -bound, bound)
    bias = jax.random.uniform(kb, (output_size,), jnp.float32, -bound, bound)
    return weight, bias


if __name__ == "__main__":
    key = jax.random.PRNGKey(0)
    k_cs, k_ag, k_param = jax.random.split(key, 3)
    weight, bias = init_params(k_param, input_size=2, output_size=4)

    def reference(cs, ag):
        # Exact math of the module (concat -> Linear), computed elementwise in f32 so
        # the reference itself cannot be affected by XLA matmul precision defaults.
        out = cs.reshape(-1, 1) * weight[0] + ag.reshape(-1, 1) * weight[1] + bias
        return jnp.squeeze(out)

    # 1) Small batch (module-scale shapes): exercises the fused XLA fallback path.
    Bs = 8
    cs_s = jax.random.normal(k_cs, (Bs, 1), jnp.float32)
    ag_s = jax.random.normal(k_ag, (Bs, 1), jnp.float32)
    out_s = jax.block_until_ready(customers_nn_forward(cs_s, ag_s, weight, bias))
    assert out_s.shape == (Bs, 4)
    assert jnp.allclose(out_s, reference(cs_s, ag_s), atol=1e-5, rtol=1e-5), "fallback mismatch"

    # 2) Pallas path, copy-free case (B % 128 == 0): no pad, no slice, single block.
    Bm = 1024
    cs_m = jax.random.normal(k_cs, (Bm, 1), jnp.float32)
    ag_m = jax.random.normal(k_ag, (Bm, 1), jnp.float32)
    out_m = jax.block_until_ready(
        customers_nn_forward(cs_m, ag_m, weight, bias, min_pallas_batch=0))
    assert out_m.shape == (Bm, 4)
    assert jnp.allclose(out_m, reference(cs_m, ag_m), atol=1e-5, rtol=1e-5), "pallas mismatch (1024)"

    # 3) Pallas path, ragged batch (pad to 128 multiple + final slice).
    Br = 1000
    cs_r = jax.random.normal(k_cs, (Br, 1), jnp.float32)
    ag_r = jax.random.normal(k_ag, (Br, 1), jnp.float32)
    out_r = jax.block_until_ready(
        customers_nn_forward(cs_r, ag_r, weight, bias, min_pallas_batch=0))
    assert out_r.shape == (Br, 4)
    assert jnp.allclose(out_r, reference(cs_r, ag_r), atol=1e-5, rtol=1e-5), "pallas mismatch (1000)"

    # 4) Pallas path, multi-step grid with a clipped partial last block
    #    (65 rows -> block_sub=24 -> grid=3, last block has 17 valid rows).
    Bg = 8320
    cs_g = jax.random.normal(k_cs, (Bg, 1), jnp.float32)
    ag_g = jax.random.normal(k_ag, (Bg, 1), jnp.float32)
    out_g = jax.block_until_ready(
        customers_nn_forward(cs_g, ag_g, weight, bias, min_pallas_batch=0))
    assert out_g.shape == (Bg, 4)
    assert jnp.allclose(out_g, reference(cs_g, ag_g), atol=1e-5, rtol=1e-5), "pallas mismatch (8320)"

    print("KERNEL_OK")
</pallas_src>

<mosaic_0001>
module attributes {stable_mosaic.version = 11 : i64} {
  func.func @_customers_kernel(%arg0: i32, %arg1: memref<128x512xf32, #tpu.memory_space<vmem>>, %arg2: memref<128x512xf32, #tpu.memory_space<vmem>>, %arg3: memref<1x512xf32, #tpu.memory_space<vmem>>, %arg4: memref<8x128xf32, #tpu.memory_space<vmem>>, %arg5: memref<8x128xf32, #tpu.memory_space<vmem>>, %arg6: memref<8x512xf32, #tpu.memory_space<vmem>>) attributes {dimension_semantics = [#tpu.dimension_semantics<parallel>], iteration_bounds = array<i64: 1>, scalar_prefetch = 0 : i64, scratch_operands = 0 : i64, tpu.core_type = #tpu.core_type<tc>, window_params = [{pipeline_mode = #tpu.pipeline_mode<synchronous>, transform_indices = @transform_0, window_bounds = array<i64: 128, 512>}, {pipeline_mode = #tpu.pipeline_mode<synchronous>, transform_indices = @transform_1, window_bounds = array<i64: 128, 512>}, {pipeline_mode = #tpu.pipeline_mode<synchronous>, transform_indices = @transform_2, window_bounds = array<i64: 1, 512>}, {transform_indices = @transform_3, window_bounds = array<i64: 8, 128>}, {transform_indices = @transform_4, window_bounds = array<i64: 8, 128>}, {transform_indices = @transform_5, window_bounds = array<i64: 8, 512>}]} {
    %c0 = arith.constant 0 : index
    %c0_0 = arith.constant 0 : index
    %0 = vector.load %arg4[%c0, %c0_0] : memref<8x128xf32, #tpu.memory_space<vmem>>, vector<8x128xf32>
    %c0_1 = arith.constant 0 : index
    %c0_2 = arith.constant 0 : index
    %1 = vector.load %arg1[%c0_1, %c0_2] : memref<128x512xf32, #tpu.memory_space<vmem>>, vector<128x512xf32>
    %cst = arith.constant dense<0.000000e+00> : vector<8x512xf32>
    %2 = tpu.matmul %0, %1, %cst {dimension_numbers = #tpu.dot_dimension_numbers<[1], [0], [0], [1], [0, 0, 1, 1], [], []>} : vector<8x128xf32>, vector<128x512xf32>, vector<8x512xf32> -> vector<8x512xf32>
    %c0_3 = arith.constant 0 : index
    %c0_4 = arith.constant 0 : index
    %3 = vector.load %arg5[%c0_3, %c0_4] : memref<8x128xf32, #tpu.memory_space<vmem>>, vector<8x128xf32>
    %c0_5 = arith.constant 0 : index
    %c0_6 = arith.constant 0 : index
    %4 = vector.load %arg2[%c0_5, %c0_6] : memref<128x512xf32, #tpu.memory_space<vmem>>, vector<128x512xf32>
    %cst_7 = arith.constant dense<0.000000e+00> : vector<8x512xf32>
    %5 = tpu.matmul %3, %4, %cst_7 {dimension_numbers = #tpu.dot_dimension_numbers<[1], [0], [0], [1], [0, 0, 1, 1], [], []>} : vector<8x128xf32>, vector<128x512xf32>, vector<8x512xf32> -> vector<8x512xf32>
    %6 = arith.addf %2, %5 : vector<8x512xf32>
    %c0_8 = arith.constant 0 : index
    %c0_9 = arith.constant 0 : index
    %7 = vector.load %arg3[%c0_8, %c0_9] : memref<1x512xf32, #tpu.memory_space<vmem>>, vector<1x512xf32>
    %8 = vector.broadcast %7 : vector<1x512xf32> to vector<8x512xf32>
    %9 = arith.addf %6, %8 : vector<8x512xf32>
    %c0_10 = arith.constant 0 : index
    %c0_11 = arith.constant 0 : index
    %10 = vector.load %arg6[%c0_10, %c0_11] : memref<8x512xf32, #tpu.memory_space<vmem>>, vector<8x512xf32>
    tpu.vector_store %arg6[%c0_10, %c0_11], %9 {strides = array<i32>} : memref<8x512xf32, #tpu.memory_space<vmem>>, vector<8x512xf32>,
    return
  }
  func.func @transform_0(%arg0: i32) -> (i32, i32) {
    %c0_i32 = arith.constant 0 : i32
    %c0_i32_0 = arith.constant 0 : i32
    %c0_i32_1 = arith.constant 0 : i32
    return %c0_i32, %c0_i32_0 : i32, i32
  }
  func.func @transform_1(%arg0: i32) -> (i32, i32) {
    %c0_i32 = arith.constant 0 : i32
    %c0_i32_0 = arith.constant 0 : i32
    %c0_i32_1 = arith.constant 0 : i32
    return %c0_i32, %c0_i32_0 : i32, i32
  }
  func.func @transform_2(%arg0: i32) -> (i32, i32) {
    %c0_i32 = arith.constant 0 : i32
    %c0_i32_0 = arith.constant 0 : i32
    %c0_i32_1 = arith.constant 0 : i32
    return %c0_i32, %c0_i32_0 : i32, i32
  }
  func.func @transform_3(%arg0: i32) -> (i32, i32) {
    %c0_i32 = arith.constant 0 : i32
    %c0_i32_0 = arith.constant 0 : i32
    return %arg0, %c0_i32 : i32, i32
  }
  func.func @transform_4(%arg0: i32) -> (i32, i32) {
    %c0_i32 = arith.constant 0 : i32
    %c0_i32_0 = arith.constant 0 : i32
    return %arg0, %c0_i32 : i32, i32
  }
  func.func @transform_5(%arg0: i32) -> (i32, i32) {
    %c0_i32 = arith.constant 0 : i32
    %c0_i32_0 = arith.constant 0 : i32
    return %arg0, %c0_i32 : i32, i32
  }
}

</mosaic_0001>

<bundles_post_ra>
// kernel: tpu_custom_call.1
= control target key start
LH: loop header
LB: loop body
LE: loop exit
PB: predicated region body
PF: predicated region fallthrough
CT: control target
= control target key end

     0   :  { %10 = vsyncpa [#allocation3], 0  ;;  %s742_s0 = inlined_call_operand.hbm [shape: f32[128,512], index: 0, kind: input, shape index: {}]   ;;  %s743_s1 = inlined_call_operand.hbm [shape: f32[128,512], index: 1, kind: input, shape index: {}]   ;;  %s744_s2 = inlined_call_operand.hbm [shape: f32[1,512], index: 2, kind: input, shape index: {}]   ;;  %s745_s3 = inlined_call_operand.hbm [shape: f32[8,128], index: 3, kind: input, shape index: {}]   ;;  %s746_s4 = inlined_call_operand.hbm [shape: f32[8,128], index: 4, kind: input, shape index: {}]   ;;  %s747_s5 = inlined_call_operand.hbm [shape: f32[8,512], index: 5, kind: output, shape index: {}]  }
   0x1   :  { %11 = vsyncpa [#allocation6], 0 }
   0x2   :  { %12 = vsyncpa [#allocation9], 0 }
   0x3   :  { %13 = vsyncpa [#allocation4], 0  ;;  %s681_s18 = smov [#allocation5]   ;;  %s682_s20 = smov [#allocation8]  }
   0x4   :  { %s31_s19 = sshll.u32 %s681_s18, 4  ;;  %s54_s21 = sshll.u32 %s682_s20, 4  ;;  %s32_s19 = int_to_ptr.vmem [resolvable:$true] %s31_s19  ;;  %s55_s21 = int_to_ptr.vmem [resolvable:$true] %s54_s21 }
   0x5   :  { %s561_s22 = scalar_lea.vmem %s32_s19, 8192  ;;  %p566_p1 = scmp.lt.s32.totalorder %s32_s19, %s32_s19 }
   0x6   :  { %p562_p0 = scmp.ne.s32.totalorder %s32_s19, %s561_s22  ;;  %p567_p2 = scmp.lt.s32.totalorder %s561_s22, %s561_s22 }
   0x8   :  { %p568_p3 = por %p567_p2, %p566_p1 }
   0xa   :  { %p569_p4 = pnand %p568_p3, %p562_p0 }
   0xc   :  { %572 = shalt.err (!%p569_p4)
}
   0xd   :  { %s683_s23 = smov 512   ;;  %s684_s24 = smov 32  }
   0xe   :  { %37 = dma.hbm_to_vmem [thread:$0]  %s743_s1, 8192, %s32_s19, [#allocation6], %s683_s23, %s683_s23, %s684_s24  }
   0xf   :  { %s581_s27 = scalar_lea.vmem %s55_s21, 128  ;;  %p586_p6 = scmp.lt.s32.totalorder %s55_s21, %s55_s21 }
  0x10   :  { %p582_p5 = scmp.ne.s32.totalorder %s55_s21, %s581_s27  ;;  %p587_p7 = scmp.lt.s32.totalorder %s581_s27, %s581_s27 }
  0x12   :  { %p588_p8 = por %p587_p7, %p586_p6 }
  0x14   :  { %p589_p9 = pnand %p588_p8, %p582_p5 }
  0x16   :  { %592 = shalt.err (!%p589_p9)
}
  0x17   :  { %57 = dma.hbm_to_vmem [thread:$0]  %s745_s3, 128, %s55_s21, [#allocation9]  }
  0x18   :  { %s685_s30 = smov [#allocation2]   ;;  %s686_s7 = smov [#allocation7]  }
  0x19   :  { %s19_s6 = sshll.u32 %s685_s30, 4  ;;  %s44_s8 = sshll.u32 %s686_s7, 4  ;;  %s20_s6 = int_to_ptr.vmem [resolvable:$true] %s19_s6  ;;  %s45_s8 = int_to_ptr.vmem [resolvable:$true] %s44_s8 }
  0x1a   :  { %s601_s9 = scalar_lea.vmem %s20_s6, 8192  ;;  %p606_p11 = scmp.lt.s32.totalorder %s20_s6, %s20_s6 }
  0x1b   :  { %p602_p10 = scmp.ne.s32.totalorder %s20_s6, %s601_s9  ;;  %p607_p12 = scmp.lt.s32.totalorder %s601_s9, %s601_s9 }
  0x1d   :  { %p608_p13 = por %p607_p12, %p606_p11 }
  0x1f   :  { %p609_p0 = pnand %p608_p13, %p602_p10 }
  0x21   :  { %612 = shalt.err (!%p609_p0)
}
  0x22   :  { %25 = dma.hbm_to_vmem [thread:$0]  %s742_s0, 8192, %s20_s6, [#allocation3], %s683_s23, %s683_s23, %s684_s24  }
  0x23   :  { %s621_s11 = scalar_lea.vmem %s45_s8, 64  ;;  %p626_p2 = scmp.lt.s32.totalorder %s45_s8, %s45_s8 }
  0x24   :  { %p622_p1 = scmp.ne.s32.totalorder %s45_s8, %s621_s11  ;;  %p627_p3 = scmp.lt.s32.totalorder %s621_s11, %s621_s11 }
  0x26   :  { %p628_p4 = por %p627_p3, %p626_p2 }
  0x28   :  { %p629_p5 = pnand %p628_p4, %p622_p1 }
  0x2a   :  { %632 = shalt.err (!%p629_p5)
}
  0x2b   :  { %47 = dma.hbm_to_vmem [thread:$0]  %s744_s2, 64, %s45_s8, [#allocation6]  }
  0x2c   :  { %s687_s13 = smov [#allocation10]  }
  0x2d   :  { %s64_s14 = sshll.u32 %s687_s13, 4  ;;  %s65_s14 = int_to_ptr.vmem [resolvable:$true] %s64_s14 }
  0x2e   :  { %s641_s15 = scalar_lea.vmem %s65_s14, 128  ;;  %p646_p7 = scmp.lt.s32.totalorder %s65_s14, %s65_s14 }
  0x2f   :  { %p642_p6 = scmp.ne.s32.totalorder %s65_s14, %s641_s15  ;;  %p647_p8 = scmp.lt.s32.totalorder %s641_s15, %s641_s15 }
  0x31   :  { %p648_p9 = por %p647_p8, %p646_p7 }
  0x33   :  { %p649_p10 = pnand %p648_p9, %p642_p6 }
  0x35   :  { %652 = shalt.err (!%p649_p10)
}
  0x36   :  { %67 = dma.hbm_to_vmem [thread:$0]  %s746_s4, 128, %s65_s14, [#allocation9]  }
  0x37   :  { %673 = dma.done.wait [#allocation3], 8192  }
  0x38   :  { %674 = vsyncadd [#allocation3], 4294959104 }
  0x39   :  { %675 = dma.done.wait [#allocation6], 8256  }
  0x3a   :  { %676 = vsyncadd [#allocation6], 4294959040 }
  0x3b   :  { %677 = dma.done.wait [#allocation9], 256  }
  0x3c   :  { %678 = vsyncadd [#allocation9], 4294967040  ;;  %v688_v0 = vmov 0.0   ;;  %v210_v1 = vld [vmem:[#allocation5 + $0x1e8] sm:$0xff]  ;;  %v212_v2 = vld [vmem:[#allocation5 + $0x1f8] sm:$0xff]  ;;  %s689_s2 = smov [#allocation11]  }
  0x3d   :  { %277 = vmatprep.mubr.f32.mxu0 %v688_v0  ;;  %348 = vmatprep.mubr.f32.mxu1 %v688_v0  ;;  %v209_v3 = vld [vmem:[#allocation5 + $0x1e0] sm:$0xff]  ;;  %v211_v4 = vld [vmem:[#allocation5 + $0x1f0] sm:$0xff]  ;;  %v206_v5 = vld [vmem:[#allocation5 + $0x1c8] sm:$0xff]  ;;  %s533_s4 = sshll.u32 %s689_s2, 4  ;;  %s534_s4 = int_to_ptr.vmem [resolvable:$true] %s533_s4 }
  0x3e   :  { %213 = vmatprep.subr.mxu0 %v210_v1  ;;  %284 = vmatprep.subr.mxu1 %v212_v2  ;;  %v208_v6 = vld [vmem:[#allocation5 + $0x1d8] sm:$0xff]  ;;  %v205_v7 = vld [vmem:[#allocation5 + $0x1c0] sm:$0xff]  ;;  %v207_v8 = vld [vmem:[#allocation5 + $0x1d0] sm:$0xff]  ;;  %s653_s17 = scalar_lea.vmem %s534_s4, 512  ;;  %p658_p12 = scmp.lt.s32.totalorder %s534_s4, %s534_s4 }
  0x3f   :  { %214 = vmatpush1.msra.mxu0 %v209_v3  ;;  %285 = vmatpush1.msra.mxu1 %v211_v4  ;;  %v202_v9 = vld [vmem:[#allocation5 + $0x1a8] sm:$0xff]  ;;  %v204_v10 = vld [vmem:[#allocation5 + $0x1b8] sm:$0xff]  ;;  %v201_v11 = vld [vmem:[#allocation5 + $0x1a0] sm:$0xff]  ;;  %p654_p11 = scmp.ne.s32.totalorder %s534_s4, %s653_s17  ;;  %p659_p13 = scmp.lt.s32.totalorder %s653_s17, %s653_s17 }
  0x40   :  { %215 = vmatprep.subr.mxu0 %v206_v5  ;;  %286 = vmatprep.subr.mxu1 %v208_v6  ;;  %v203_v12 = vld [vmem:[#allocation5 + $0x1b0] sm:$0xff]  ;;  %v198_v13 = vld [vmem:[#allocation5 + $0x188] sm:$0xff]  ;;  %v200_v14 = vld [vmem:[#allocation5 + $0x198] sm:$0xff] }
  0x41   :  { %216 = vmatpush1.msra.mxu0 %v205_v7  ;;  %287 = vmatpush1.msra.mxu1 %v207_v8  ;;  %v197_v15 = vld [vmem:[#allocation5 + $0x180] sm:$0xff]  ;;  %v199_v16 = vld [vmem:[#allocation5 + $0x190] sm:$0xff]  ;;  %v194_v17 = vld [vmem:[#allocation5 + $0x168] sm:$0xff]  ;;  %p660_p0 = por %p659_p13, %p658_p12 }
  0x42   :  { %217 = vmatprep.subr.mxu0 %v202_v9  ;;  %288 = vmatprep.subr.mxu1 %v204_v10  ;;  %v196_v18 = vld [vmem:[#allocation5 + $0x178] sm:$0xff]  ;;  %v193_v19 = vld [vmem:[#allocation5 + $0x160] sm:$0xff]  ;;  %v195_v20 = vld [vmem:[#allocation5 + $0x170] sm:$0xff] }
  0x43   :  { %218 = vmatpush1.msra.mxu0 %v201_v11  ;;  %289 = vmatpush1.msra.mxu1 %v203_v12  ;;  %v190_v21 = vld [vmem:[#allocation5 + $0x148] sm:$0xff]  ;;  %v192_v22 = vld [vmem:[#allocation5 + $0x158] sm:$0xff]  ;;  %v189_v23 = vld [vmem:[#allocation5 + $0x140] sm:$0xff]  ;;  %p661_p1 = pnand %p660_p0, %p654_p11 }
  0x44   :  { %219 = vmatprep.subr.mxu0 %v198_v13  ;;  %290 = vmatprep.subr.mxu1 %v200_v14  ;;  %v191_v24 = vld [vmem:[#allocation5 + $0x150] sm:$0xff]  ;;  %v186_v25 = vld [vmem:[#allocation5 + $0x128] sm:$0xff]  ;;  %v188_v26 = vld [vmem:[#allocation5 + $0x138] sm:$0xff] }
  0x45   :  { %220 = vmatpush1.msra.mxu0 %v197_v15  ;;  %291 = vmatpush1.msra.mxu1 %v199_v16  ;;  %v185_v27 = vld [vmem:[#allocation5 + $0x120] sm:$0xff]  ;;  %v187_v28 = vld [vmem:[#allocation5 + $0x130] sm:$0xff]  ;;  %v182_v29 = vld [vmem:[#allocation5 + $0x108] sm:$0xff] }
  0x46   :  { %221 = vmatprep.subr.mxu0 %v194_v17  ;;  %292 = vmatprep.subr.mxu1 %v196_v18  ;;  %v184_v30 = vld [vmem:[#allocation5 + $0x118] sm:$0xff]  ;;  %v181_v31 = vld [vmem:[#allocation5 + $0x100] sm:$0xff]  ;;  %v183_v32 = vld [vmem:[#allocation5 + $0x110] sm:$0xff] }
  0x47   :  { %222 = vmatpush1.msra.mxu0 %v193_v19  ;;  %293 = vmatpush1.msra.mxu1 %v195_v20  ;;  %v178_v33 = vld [vmem:[#allocation5 + $0xe8] sm:$0xff]  ;;  %v180_v34 = vld [vmem:[#allocation5 + $0xf8] sm:$0xff]  ;;  %v177_v35 = vld [vmem:[#allocation5 + $0xe0] sm:$0xff] }
  0x48   :  { %223 = vmatprep.subr.mxu0 %v190_v21  ;;  %294 = vmatprep.subr.mxu1 %v192_v22  ;;  %v179_v36 = vld [vmem:[#allocation5 + $0xf0] sm:$0xff]  ;;  %v174_v37 = vld [vmem:[#allocation5 + $0xc8] sm:$0xff]  ;;  %v176_v38 = vld [vmem:[#allocation5 + $0xd8] sm:$0xff] }
  0x49   :  { %224 = vmatpush1.msra.mxu0 %v189_v23  ;;  %295 = vmatpush1.msra.mxu1 %v191_v24  ;;  %v173_v39 = vld [vmem:[#allocation5 + $0xc0] sm:$0xff]  ;;  %v175_v40 = vld [vmem:[#allocation5 + $0xd0] sm:$0xff]  ;;  %v170_v41 = vld [vmem:[#allocation5 + $0xa8] sm:$0xff] }
  0x4a   :  { %225 = vmatprep.subr.mxu0 %v186_v25  ;;  %296 = vmatprep.subr.mxu1 %v188_v26  ;;  %v172_v42 = vld [vmem:[#allocation5 + $0xb8] sm:$0xff]  ;;  %v169_v43 = vld [vmem:[#allocation5 + $0xa0] sm:$0xff]  ;;  %v171_v44 = vld [vmem:[#allocation5 + $0xb0] sm:$0xff] }
  0x4b   :  { %226 = vmatpush1.msra.mxu0 %v185_v27  ;;  %297 = vmatpush1.msra.mxu1 %v187_v28  ;;  %v166_v45 = vld [vmem:[#allocation5 + $0x88] sm:$0xff]  ;;  %v168_v46 = vld [vmem:[#allocation5 + $0x98] sm:$0xff]  ;;  %v165_v47 = vld [vmem:[#allocation5 + $0x80] sm:$0xff] }
  0x4c   :  { %227 = vmatprep.subr.mxu0 %v182_v29  ;;  %298 = vmatprep.subr.mxu1 %v184_v30  ;;  %v167_v48 = vld [vmem:[#allocation5 + $0x90] sm:$0xff]  ;;  %v162_v49 = vld [vmem:[#allocation5 + $0x68] sm:$0xff]  ;;  %v164_v50 = vld [vmem:[#allocation5 + $0x78] sm:$0xff] }
  0x4d   :  { %228 = vmatpush1.msra.mxu0 %v181_v31  ;;  %299 = vmatpush1.msra.mxu1 %v183_v32  ;;  %v161_v51 = vld [vmem:[#allocation5 + $0x60] sm:$0xff]  ;;  %v163_v52 = vld [vmem:[#allocation5 + $0x70] sm:$0xff]  ;;  %v158_v53 = vld [vmem:[#allocation5 + $0x48] sm:$0xff] }
  0x4e   :  { %229 = vmatprep.subr.mxu0 %v178_v33  ;;  %300 = vmatprep.subr.mxu1 %v180_v34  ;;  %v160_v54 = vld [vmem:[#allocation5 + $0x58] sm:$0xff]  ;;  %v157_v55 = vld [vmem:[#allocation5 + $0x40] sm:$0xff]  ;;  %v159_v56 = vld [vmem:[#allocation5 + $0x50] sm:$0xff] }
  0x4f   :  { %230 = vmatpush1.msra.mxu0 %v177_v35  ;;  %301 = vmatpush1.msra.mxu1 %v179_v36  ;;  %v154_v57 = vld [vmem:[#allocation5 + $0x28] sm:$0xff]  ;;  %v156_v58 = vld [vmem:[#allocation5 + $0x38] sm:$0xff]  ;;  %v153_v59 = vld [vmem:[#allocation5 + $0x20] sm:$0xff] }
  0x50   :  { %231 = vmatprep.subr.mxu0 %v174_v37  ;;  %302 = vmatprep.subr.mxu1 %v176_v38  ;;  %v155_v60 = vld [vmem:[#allocation5 + $0x30] sm:$0xff]  ;;  %v150_v61 = vld [vmem:[#allocation5 + $0x8] sm:$0xff]  ;;  %v152_v62 = vld [vmem:[#allocation5 + $0x18] sm:$0xff] }
  0x51   :  { %232 = vmatpush1.msra.mxu0 %v173_v39  ;;  %303 = vmatpush1.msra.mxu1 %v175_v40  ;;  %v149_v63 = vld [vmem:[#allocation5] sm:$0xff]  ;;  %v151_v1 = vld [vmem:[#allocation5 + $0x10] sm:$0xff]  ;;  %v145_v3 = vld [vmem:[#allocation2 + $0x1e8] sm:$0xff] }
  0x52   :  { %233 = vmatprep.subr.mxu0 %v170_v41  ;;  %304 = vmatprep.subr.mxu1 %v172_v42  ;;  %v148_v2 = vld [vmem:[#allocation10] sm:$0xff]  ;;  %v147_v4 = vld [vmem:[#allocation2 + $0x1f8] sm:$0xff]  ;;  %v144_v5 = vld [vmem:[#allocation2 + $0x1e0] sm:$0xff] }
  0x53   :  { %234 = vmatpush1.msra.mxu0 %v169_v43  ;;  %305 = vmatpush1.msra.mxu1 %v171_v44  ;;  %v146_v6 = vld [vmem:[#allocation2 + $0x1f0] sm:$0xff]  ;;  %v141_v7 = vld [vmem:[#allocation2 + $0x1c8] sm:$0xff]  ;;  %v143_v8 = vld [vmem:[#allocation2 + $0x1d8] sm:$0xff] }
  0x54   :  { %235 = vmatprep.subr.mxu0 %v166_v45  ;;  %306 = vmatprep.subr.mxu1 %v168_v46  ;;  %v140_v9 = vld [vmem:[#allocation2 + $0x1c0] sm:$0xff]  ;;  %v142_v10 = vld [vmem:[#allocation2 + $0x1d0] sm:$0xff]  ;;  %v137_v11 = vld [vmem:[#allocation2 + $0x1a8] sm:$0xff] }
  0x55   :  { %236 = vmatpush1.msra.mxu0 %v165_v47  ;;  %307 = vmatpush1.msra.mxu1 %v167_v48  ;;  %v139_v12 = vld [vmem:[#allocation2 + $0x1b8] sm:$0xff]  ;;  %v136_v13 = vld [vmem:[#allocation2 + $0x1a0] sm:$0xff]  ;;  %v138_v14 = vld [vmem:[#allocation2 + $0x1b0] sm:$0xff] }
  0x56   :  { %237 = vmatprep.subr.mxu0 %v162_v49  ;;  %308 = vmatprep.subr.mxu1 %v164_v50  ;;  %v133_v15 = vld [vmem:[#allocation2 + $0x188] sm:$0xff]  ;;  %v135_v16 = vld [vmem:[#allocation2 + $0x198] sm:$0xff]  ;;  %v132_v17 = vld [vmem:[#allocation2 + $0x180] sm:$0xff] }
  0x57   :  { %238 = vmatpush1.msra.mxu0 %v161_v51  ;;  %309 = vmatpush1.msra.mxu1 %v163_v52  ;;  %v134_v18 = vld [vmem:[#allocation2 + $0x190] sm:$0xff]  ;;  %v129_v19 = vld [vmem:[#allocation2 + $0x168] sm:$0xff]  ;;  %v131_v20 = vld [vmem:[#allocation2 + $0x178] sm:$0xff] }
  0x58   :  { %239 = vmatprep.subr.mxu0 %v158_v53  ;;  %310 = vmatprep.subr.mxu1 %v160_v54  ;;  %v128_v21 = vld [vmem:[#allocation2 + $0x160] sm:$0xff]  ;;  %v130_v22 = vld [vmem:[#allocation2 + $0x170] sm:$0xff]  ;;  %v125_v23 = vld [vmem:[#allocation2 + $0x148] sm:$0xff] }
  0x59   :  { %240 = vmatpush1.msra.mxu0 %v157_v55  ;;  %311 = vmatpush1.msra.mxu1 %v159_v56  ;;  %v127_v24 = vld [vmem:[#allocation2 + $0x158] sm:$0xff]  ;;  %v124_v25 = vld [vmem:[#allocation2 + $0x140] sm:$0xff]  ;;  %v126_v26 = vld [vmem:[#allocation2 + $0x150] sm:$0xff] }
  0x5a   :  { %241 = vmatprep.subr.mxu0 %v154_v57  ;;  %312 = vmatprep.subr.mxu1 %v156_v58  ;;  %v121_v27 = vld [vmem:[#allocation2 + $0x128] sm:$0xff]  ;;  %v123_v28 = vld [vmem:[#allocation2 + $0x138] sm:$0xff]  ;;  %v120_v29 = vld [vmem:[#allocation2 + $0x120] sm:$0xff] }
  0x5b   :  { %242 = vmatpush1.msra.mxu0 %v153_v59  ;;  %313 = vmatpush1.msra.mxu1 %v155_v60  ;;  %v122_v30 = vld [vmem:[#allocation2 + $0x130] sm:$0xff]  ;;  %v117_v31 = vld [vmem:[#allocation2 + $0x108] sm:$0xff]  ;;  %v119_v32 = vld [vmem:[#allocation2 + $0x118] sm:$0xff] }
  0x5c   :  { %243 = vmatprep.subr.mxu0 %v150_v61  ;;  %314 = vmatprep.subr.mxu1 %v152_v62  ;;  %v116_v33 = vld [vmem:[#allocation2 + $0x100] sm:$0xff]  ;;  %v118_v34 = vld [vmem:[#allocation2 + $0x110] sm:$0xff]  ;;  %v113_v35 = vld [vmem:[#allocation2 + $0xe8] sm:$0xff] }
  0x5d   :  { %244 = vmatpush1.msra.mxu0 %v149_v63  ;;  %315 = vmatpush1.msra.mxu1 %v151_v1  ;;  %v115_v36 = vld [vmem:[#allocation2 + $0xf8] sm:$0xff]  ;;  %v112_v37 = vld [vmem:[#allocation2 + $0xe0] sm:$0xff]  ;;  %v114_v38 = vld [vmem:[#allocation2 + $0xf0] sm:$0xff] }
  0x5e   :  { %278 = vmatmul.mubr.f32.vlgmr.msra.gmra.mxu0 %v148_v2  ;;  %349 = vmatmul.mubr.f32.vlgmr.msra.gmra.mxu1 %v148_v2  ;;  %v109_v39 = vld [vmem:[#allocation2 + $0xc8] sm:$0xff]  ;;  %v111_v40 = vld [vmem:[#allocation2 + $0xd8] sm:$0xff]  ;;  %v108_v41 = vld [vmem:[#allocation2 + $0xc0] sm:$0xff] }
  0x5f   :  { %355 = vmatprep.subr.mxu0 %v145_v3  ;;  %426 = vmatprep.subr.mxu1 %v147_v4  ;;  %v110_v42 = vld [vmem:[#allocation2 + $0xd0] sm:$0xff]  ;;  %v105_v43 = vld [vmem:[#allocation2 + $0xa8] sm:$0xff]  ;;  %v107_v44 = vld [vmem:[#allocation2 + $0xb8] sm:$0xff] }
  0x60   :  { %356 = vmatpush1.msra.mxu0 %v144_v5  ;;  %427 = vmatpush1.msra.mxu1 %v146_v6  ;;  %v104_v45 = vld [vmem:[#allocation2 + $0xa0] sm:$0xff]  ;;  %v106_v46 = vld [vmem:[#allocation2 + $0xb0] sm:$0xff]  ;;  %v101_v47 = vld [vmem:[#allocation2 + $0x88] sm:$0xff]  ;;  %v499_v5 = vlaneseq }
  0x61   :  { %357 = vmatprep.subr.mxu0 %v141_v7  ;;  %428 = vmatprep.subr.mxu1 %v143_v8  ;;  %v103_v48 = vld [vmem:[#allocation2 + $0x98] sm:$0xff]  ;;  %v100_v49 = vld [vmem:[#allocation2 + $0x80] sm:$0xff]  ;;  %v102_v50 = vld [vmem:[#allocation2 + $0x90] sm:$0xff] }
  0x62   :  { %358 = vmatpush1.msra.mxu0 %v140_v9  ;;  %429 = vmatpush1.msra.mxu1 %v142_v10  ;;  %v97_v51 = vld [vmem:[#allocation2 + $0x68] sm:$0xff]  ;;  %v99_v52 = vld [vmem:[#allocation2 + $0x78] sm:$0xff]  ;;  %v96_v53 = vld [vmem:[#allocation2 + $0x60] sm:$0xff]  ;;  %v500_v6 = vshrl.u32 %v499_v5, 7 }
  0x63   :  { %359 = vmatprep.subr.mxu0 %v137_v11  ;;  %430 = vmatprep.subr.mxu1 %v139_v12  ;;  %v98_v54 = vld [vmem:[#allocation2 + $0x70] sm:$0xff]  ;;  %v93_v55 = vld [vmem:[#allocation2 + $0x48] sm:$0xff]  ;;  %v95_v56 = vld [vmem:[#allocation2 + $0x58] sm:$0xff] }
  0x64   :  { %360 = vmatpush1.msra.mxu0 %v136_v13  ;;  %431 = vmatpush1.msra.mxu1 %v138_v14  ;;  %v92_v57 = vld [vmem:[#allocation2 + $0x40] sm:$0xff]  ;;  %v94_v58 = vld [vmem:[#allocation2 + $0x50] sm:$0xff]  ;;  %v89_v59 = vld [vmem:[#allocation2 + $0x28] sm:$0xff]  ;;  %v501_v9 = vsub.s32 0, %v500_v6  ;;  %v509_v10 = vsub.s32 2, %v500_v6  ;;  %v505_v12 = vsub.s32 1, %v500_v6 }
  0x65   :  { %361 = vmatprep.subr.mxu0 %v133_v15  ;;  %432 = vmatprep.subr.mxu1 %v135_v16  ;;  %v91_v60 = vld [vmem:[#allocation2 + $0x38] sm:$0xff]  ;;  %v88_v61 = vld [vmem:[#allocation2 + $0x20] sm:$0xff]  ;;  %v90_v62 = vld [vmem:[#allocation2 + $0x30] sm:$0xff]  ;;  %v513_v13 = vsub.s32 3, %v500_v6 }
  0x66   :  { %362 = vmatpush1.msra.mxu0 %v132_v17  ;;  %433 = vmatpush1.msra.mxu1 %v134_v18  ;;  %v85_v63 = vld [vmem:[#allocation2 + $0x8] sm:$0xff]  ;;  %v87_v1 = vld [vmem:[#allocation2 + $0x18] sm:$0xff]  ;;  %v84_v2 = vld [vmem:[#allocation2] sm:$0xff] }
  0x67   :  { %363 = vmatprep.subr.mxu0 %v129_v19  ;;  %434 = vmatprep.subr.mxu1 %v131_v20  ;;  %v86_v3 = vld [vmem:[#allocation2 + $0x10] sm:$0xff]  ;;  %v83_v4 = vld [vmem:[#allocation8] sm:$0xff]  ;;  %v497_v11 = vld [vmem:[#allocation7] sm:$0xf] }
  0x68   :  { %364 = vmatpush1.msra.mxu0 %v128_v21  ;;  %435 = vmatpush1.msra.mxu1 %v130_v22  ;;  %v502_v16 = vrot.slane %v497_v11, %v501_v9  ;;  %v510_v17 = vrot.slane %v497_v11, %v509_v10  ;;  %v514_v22 = vrot.slane %v497_v11, %v513_v13 }
  0x69   :  { %365 = vmatprep.subr.mxu0 %v125_v23  ;;  %436 = vmatprep.subr.mxu1 %v127_v24 }
  0x6a   :  { %366 = vmatpush1.msra.mxu0 %v124_v25  ;;  %437 = vmatpush1.msra.mxu1 %v126_v26 }
  0x6b   :  { %367 = vmatprep.subr.mxu0 %v121_v27  ;;  %438 = vmatprep.subr.mxu1 %v123_v28 }
  0x6c   :  { %368 = vmatpush1.msra.mxu0 %v120_v29  ;;  %439 = vmatpush1.msra.mxu1 %v122_v30 }
  0x6d   :  { %369 = vmatprep.subr.mxu0 %v117_v31  ;;  %440 = vmatprep.subr.mxu1 %v119_v32 }
  0x6e   :  { %370 = vmatpush1.msra.mxu0 %v116_v33  ;;  %441 = vmatpush1.msra.mxu1 %v118_v34 }
  0x6f   :  { %371 = vmatprep.subr.mxu0 %v113_v35  ;;  %442 = vmatprep.subr.mxu1 %v115_v36 }
  0x70   :  { %372 = vmatpush1.msra.mxu0 %v112_v37  ;;  %443 = vmatpush1.msra.mxu1 %v114_v38 }
  0x71   :  { %373 = vmatprep.subr.mxu0 %v109_v39  ;;  %444 = vmatprep.subr.mxu1 %v111_v40 }
  0x72   :  { %374 = vmatpush1.msra.mxu0 %v108_v41  ;;  %445 = vmatpush1.msra.mxu1 %v110_v42 }
  0x73   :  { %375 = vmatprep.subr.mxu0 %v105_v43  ;;  %446 = vmatprep.subr.mxu1 %v107_v44 }
  0x74   :  { %376 = vmatpush1.msra.mxu0 %v104_v45  ;;  %447 = vmatpush1.msra.mxu1 %v106_v46 }
  0x75   :  { %377 = vmatprep.subr.mxu0 %v101_v47  ;;  %448 = vmatprep.subr.mxu1 %v103_v48 }
  0x76   :  { %378 = vmatpush1.msra.mxu0 %v100_v49  ;;  %449 = vmatpush1.msra.mxu1 %v102_v50 }
  0x77   :  { %379 = vmatprep.subr.mxu0 %v97_v51  ;;  %450 = vmatprep.subr.mxu1 %v99_v52 }
  0x78   :  { %380 = vmatpush1.msra.mxu0 %v96_v53  ;;  %451 = vmatpush1.msra.mxu1 %v98_v54 }
  0x79   :  { %381 = vmatprep.subr.mxu0 %v93_v55  ;;  %452 = vmatprep.subr.mxu1 %v95_v56 }
  0x7a   :  { %382 = vmatpush1.msra.mxu0 %v92_v57  ;;  %453 = vmatpush1.msra.mxu1 %v94_v58 }
  0x7b   :  { %383 = vmatprep.subr.mxu0 %v89_v59  ;;  %454 = vmatprep.subr.mxu1 %v91_v60 }
  0x7c   :  { %384 = vmatpush1.msra.mxu0 %v88_v61  ;;  %455 = vmatpush1.msra.mxu1 %v90_v62 }
  0x7d   :  { %385 = vmatprep.subr.mxu0 %v85_v63  ;;  %456 = vmatprep.subr.mxu1 %v87_v1 }
  0x7e   :  { %386 = vmatpush1.msra.mxu0 %v84_v2  ;;  %419 = vmatprep.mubr.f32.mxu0 %v688_v0 }
  0x7f   :  { %457 = vmatpush1.msra.mxu1 %v86_v3  ;;  %490 = vmatprep.mubr.f32.mxu1 %v688_v0  ;;  %v506_v0 = vrot.slane %v497_v11, %v505_v12 }
  0x80   :  { %420 = vmatmul.mubr.f32.vlgmr.msra.gmra.mxu0 %v83_v4  ;;  %491 = vmatmul.mubr.f32.vlgmr.msra.gmra.mxu1 %v83_v4 }
 0x11e   :  { %v279_v7 = vpop.f32.mrf.mxu0  ;;  %v350_v8 = vpop.f32.mrf.mxu1 }
 0x120   :  { %v281_v14 = vpop.f32.mrf.mxu0  ;;  %v352_v15 = vpop.f32.mrf.mxu1 }
 0x140   :  { %v421_v18 = vpop.f32.mrf.mxu0  ;;  %v492_v19 = vpop.f32.mrf.mxu1 }
 0x141   :  { %v422_v20 = vadd.f32 %v421_v18, %v279_v7  ;;  %v493_v21 = vadd.f32 %v492_v19, %v350_v8 }
 0x142   :  { %v423_v23 = vpop.f32.mrf.mxu0  ;;  %v494_v24 = vpop.f32.mrf.mxu1 }
 0x143   :  { %v519_v25 = vadd.f32 %v502_v16, %v422_v20  ;;  %v521_v26 = vadd.f32 %v510_v17, %v493_v21  ;;  %v424_v27 = vadd.f32 %v423_v23, %v281_v14  ;;  %v495_v28 = vadd.f32 %v494_v24, %v352_v15 }
 0x145   :  { %523 = vst [vmem:[#allocation11] sm:$0xff] %v519_v25  ;;  %525 = vst [vmem:[#allocation11 + $0x10] sm:$0xff] %v521_v26  ;;  %v520_v29 = vadd.f32 %v506_v0, %v424_v27  ;;  %v522_v30 = vadd.f32 %v514_v22, %v495_v28 }
 0x147   :  { %524 = vst [vmem:[#allocation11 + $0x8] sm:$0xff] %v520_v29  ;;  %526 = vst [vmem:[#allocation11 + $0x18] sm:$0xff] %v522_v30 }
 0x148   :  { %664 = shalt.err (!%p661_p1)
}
 0x149   :  { %536 = dma.vmem_to_hbm [thread:$0]  %s534_s4, 512, %s747_s5, [#allocation4]  }
 0x14a   :  { %679 = dma.done.wait [#allocation4], 512  }
 0x14b   :  { %680 = vsyncadd [#allocation4], 4294966784 }
 0x14c   :  { %540 = vsyncpa [#allocation3], 1 }
 0x14d   :  { %541 = vsyncpa [#allocation6], 1 }
 0x14e   :  { %542 = vsyncpa [#allocation9], 1 }
 0x14f   :  { %543 = vsyncpa [#allocation4], 1 }

</bundles_post_ra>
